<compile_context>
chip_gen: v7x
topology: tpu7x:2x2x1
jax: 0.10.0
libtpu: 0.0.40
codegen_flags: <defaults>
</compile_context>

<pallas_src>
import jax
import jax.numpy as jnp
from jax.experimental import pallas as pl
from jax.experimental.pallas import tpu as pltpu


def _round_up(n: int, m: int) -> int:
    return ((n + m - 1) // m) * m


def linear_kernel(x_ref, w_ref, b_ref, o_ref):
    # x_ref: (Bt, D) f32  -- streamed batch tile (double-buffered by Pallas)
    # w_ref: (1, D)  f32  -- lane-dense weight, resident in VMEM across steps
    # b_ref: (1,)    f32  -- scalar bias in SMEM (free scalar read)
    # o_ref: (Bt, 1) f32
    x = x_ref[...]
    w = w_ref[...]
    b = b_ref[0]
    # VPU multiply (w broadcast over sublanes) + XLU lane-reduce over D.
    y = jnp.sum(x * w, axis=-1, keepdims=True)        # (Bt, 1), f32 accumulate
    o_ref[...] = y + b


def _choose_block_rows(num_inputs: int) -> int:
    # Target ~2 MiB of x per tile (pipeline double-buffers it -> ~4 MiB),
    # capped at 2048 rows so the working set fits scoped VMEM on every
    # generation (v5e/v6e/v7x) with large headroom.
    rows = (2 * 1024 * 1024) // max(4 * num_inputs, 1)
    return max(8, min(2048, rows))


def linear_net_forward(x, weight, bias, *, block_rows=None):
    """Pallas equivalent of LinearNet.forward.

    x:      (B, D) float32
    weight: (1, D) float32   (native PyTorch nn.Linear layout; NOT transposed)
    bias:   (1,)   float32
    returns (B, 1) float32
    """
    x = jnp.asarray(x, jnp.float32)
    weight = jnp.asarray(weight, jnp.float32)
    bias = jnp.asarray(bias, jnp.float32).reshape(1)

    B, D = x.shape
    assert weight.shape == (1, D)

    bt = block_rows if block_rows is not None else _choose_block_rows(D)
    if B <= bt:
        bt = _round_up(max(B, 1), 8)        # single step; just sublane-align
    else:
        bt = max(8, (bt // 8) * 8)          # tile rows must be a multiple of 8

    num_tiles = (B + bt - 1) // bt
    padded_b = num_tiles * bt
    if padded_b != B:
        # Padded tail rows produce junk outputs that are sliced off below;
        # nothing in the kernel reduces across the batch axis, so this is safe.
        x = jnp.pad(x, ((0, padded_b - B), (0, 0)))

    out = pl.pallas_call(
        linear_kernel,
        out_shape=jax.ShapeDtypeStruct((padded_b, 1), jnp.float32),
        grid=(num_tiles,),
        in_specs=[
            # x: streamed over the batch grid axis (auto double-buffered).
            pl.BlockSpec((bt, D), lambda i: (i, 0)),
            # weight: constant index_map -> fetched once, resident in VMEM.
            pl.BlockSpec((1, D), lambda i: (0, 0)),
            # bias: scalar in SMEM, not a padded (8,128) VMEM tile.
            pl.BlockSpec(memory_space=pltpu.MemorySpace.SMEM),
        ],
        out_specs=pl.BlockSpec((bt, 1), lambda i: (i, 0)),
        compiler_params=pltpu.CompilerParams(
            # Batch steps are independent -> shard across v7x's 2 TensorCores.
            dimension_semantics=("parallel",),
            # Explicit scoped-VMEM limit with headroom, valid on v5e/v6e/v7x.
            vmem_limit_bytes=32 * 1024 * 1024,
        ),
    )(x, weight, bias)

    return out[:B]


if __name__ == "__main__":
    key = jax.random.PRNGKey(0)
    kx, kw, kb = jax.random.split(key, 3)

    batch, num_inputs = 260, 32            # small; 260 exercises tail padding

    x = jax.random.normal(kx, (batch, num_inputs), dtype=jnp.float32)
    # Deterministic init mimicking nn.Linear's uniform(-1/sqrt(D), 1/sqrt(D)).
    bound = 1.0 / jnp.sqrt(num_inputs)
    weight = jax.random.uniform(kw, (1, num_inputs), minval=-bound,
                                maxval=bound, dtype=jnp.float32)
    bias = jax.random.uniform(kb, (1,), minval=-bound, maxval=bound,
                              dtype=jnp.float32)

    # block_rows=128 forces a multi-step grid (3 tiles) even at this toy size,
    # exercising the pipelined/tail-padded path.
    y = linear_net_forward(x, weight, bias, block_rows=128)
    y = jax.block_until_ready(y)

    # Matmul-free f32 reference (avoids TPU matmul default-precision ambiguity).
    y_ref = jnp.sum(x * weight, axis=-1, keepdims=True) + bias

    assert y.shape == (batch, 1)
    assert jnp.allclose(y, y_ref, atol=1e-5, rtol=1e-5)

    print("KERNEL_OK")
</pallas_src>

<mosaic_0001>
module attributes {stable_mosaic.version = 11 : i64} {
  func.func @linear_kernel(%arg0: i32, %arg1: memref<128x32xf32, #tpu.memory_space<vmem>>, %arg2: memref<1x32xf32, #tpu.memory_space<vmem>>, %arg3: memref<1xf32, #tpu.memory_space<smem>>, %arg4: memref<128x1xf32, #tpu.memory_space<vmem>>) attributes {dimension_semantics = [#tpu.dimension_semantics<parallel>], iteration_bounds = array<i64: 3>, scalar_prefetch = 0 : i64, scratch_operands = 0 : i64, tpu.core_type = #tpu.core_type<tc>, window_params = [{transform_indices = @transform_0, window_bounds = array<i64: 128, 32>}, {pipeline_mode = #tpu.pipeline_mode<synchronous>, transform_indices = @transform_1, window_bounds = array<i64: 1, 32>}, {transform_indices = @transform_2, window_bounds = array<i64: 1>}, {transform_indices = @transform_3, window_bounds = array<i64: 128, 1>}]} {
    %c0 = arith.constant 0 : index
    %c0_0 = arith.constant 0 : index
    %0 = vector.load %arg1[%c0, %c0_0] : memref<128x32xf32, #tpu.memory_space<vmem>>, vector<128x32xf32>
    %c0_1 = arith.constant 0 : index
    %c0_2 = arith.constant 0 : index
    %1 = vector.load %arg2[%c0_1, %c0_2] : memref<1x32xf32, #tpu.memory_space<vmem>>, vector<1x32xf32>
    %c0_3 = arith.constant 0 : index
    %2 = memref.load %arg3[%c0_3] : memref<1xf32, #tpu.memory_space<smem>>
    %3 = vector.broadcast %1 : vector<1x32xf32> to vector<128x32xf32>
    %4 = arith.mulf %0, %3 : vector<128x32xf32>
    %cst = arith.constant dense<0.000000e+00> : vector<128xf32>
    %5 = vector.multi_reduction <add>, %4, %cst [1] : vector<128x32xf32> to vector<128xf32>
    %6 = vector.shape_cast %5 : vector<128xf32> to vector<128x1xf32>
    %7 = vector.broadcast %2 : f32 to vector<128x1xf32>
    %8 = arith.addf %6, %7 : vector<128x1xf32>
    %c0_4 = arith.constant 0 : index
    %c0_5 = arith.constant 0 : index
    %9 = vector.load %arg4[%c0_4, %c0_5] : memref<128x1xf32, #tpu.memory_space<vmem>>, vector<128x1xf32>
    tpu.vector_store %arg4[%c0_4, %c0_5], %8 {strides = array<i32>} : memref<128x1xf32, #tpu.memory_space<vmem>>, vector<128x1xf32>,
    return
  }
  func.func @transform_0(%arg0: i32) -> (i32, i32) {
    %c0_i32 = arith.constant 0 : i32
    %c0_i32_0 = arith.constant 0 : i32
    return %arg0, %c0_i32 : i32, i32
  }
  func.func @transform_1(%arg0: i32) -> (i32, i32) {
    %c0_i32 = arith.constant 0 : i32
    %c0_i32_0 = arith.constant 0 : i32
    %c0_i32_1 = arith.constant 0 : i32
    return %c0_i32, %c0_i32_0 : i32, i32
  }
  func.func @transform_2(%arg0: i32) -> i32 {
    %c0_i32 = arith.constant 0 : i32
    %c0_i32_0 = arith.constant 0 : i32
    return %c0_i32 : i32
  }
  func.func @transform_3(%arg0: i32) -> (i32, i32) {
    %c0_i32 = arith.constant 0 : i32
    %c0_i32_0 = arith.constant 0 : i32
    return %arg0, %c0_i32 : i32, i32
  }
}

</mosaic_0001>

<bundles_post_ra>
// kernel: tpu_custom_call.1
= control target key start
LH: loop header
LB: loop body
LE: loop exit
PB: predicated region body
PF: predicated region fallthrough
CT: control target
= control target key end

     0   :  { %s405_s14 = smov 0   ;;  %s500_s0 = inlined_call_operand.vmem [shape: f32[384,32], index: 0, kind: input, shape index: {}]   ;;  %s501_s1 = inlined_call_operand.vmem [shape: f32[1,32], index: 1, kind: input, shape index: {}]   ;;  %s502_s2 = inlined_call_operand.<no memory space> [shape: f32[1], index: 2, kind: input, shape index: {}]   ;;  %s503_s3 = inlined_call_operand.vmem [shape: f32[384,1], index: 3, kind: output, shape index: {}]  }
   0x1   :  { %8 = sst [smem:[#allocation2]] %s502_s2 }
   0x2 LB: > { %s354_s15 = sadd.s32 4294967295, %s380_s14   ;;  %p358_p0 = scmp.ge.s32.totalorder %s380_s14, 1  ;;  %s380_s14 = sphi %s405_s14, %s14_s14  }
   0x3   : > { %p139_p1 = scmp.lt.s32.totalorder %s380_s14, 4 }
   0x5   : > { %p140_p2 = pnand %p358_p0, %p139_p1 }
   0x6   : > { %s359_s16 = sshll.u32 (!%p140_p2), %s354_s15, 4  ;;  %v363_v0 = vld [vmem:[%s501_s1] ss:$0 sm:$0xff] (!%p140_p2)  ;;  %vm215_vm0 = vcmask (!%p140_p2), 261120   ;;  %s192_s22 = sld [smem:[#allocation2]] (!%p140_p2)  ;;  %vm281_vm1 = vcmask (!%p140_p2), 7168  }
   0x7   : > { %143 = sbr.rel (%p140_p2) target bundleno = 194 (0xc2), region = 32  ;;  %p164_p3 = scmp.lt.s32.totalorder (!%p140_p2), %s359_s16, 47 }
   0xc   : > { %v264_v49 = vstv (!%p140_p2), %s192_s22 }
   0xe   : > { %s505_s16 = smov (!%p164_p3, %s359_s16), 47 }
   0xf   : > { %s360_s2 = sshll.u32 %s505_s16, 3 }
  0x10   : > { %s424_s21 = scalar_lea.vmem %s500_s0, %s360_s2  ;;  %s463_s25 = scalar_lea.vmem %s503_s3, %s360_s2 }
  0x11   : > { %v177_v1 = vld [vmem:[%s424_s21 + $0x10] sm:$0xff]  ;;  %v175_v2 = vld [vmem:[%s424_s21] sm:$0xff]  ;;  %v178_v3 = vld [vmem:[%s424_s21 + $0x18] sm:$0xff] }
  0x12   : > { %v201_v4 = vmul.f32 %v363_v0, %v177_v1  ;;  %v199_v5 = vmul.f32 %v363_v0, %v175_v2  ;;  %v202_v6 = vmul.f32 %v363_v0, %v178_v3  ;;  %v176_v7 = vld [vmem:[%s424_s21 + $0x8] sm:$0xff]  ;;  %v179_v10 = vld [vmem:[%s424_s21 + $0x20] sm:$0xff]  ;;  %v182_v17 = vld [vmem:[%s424_s21 + $0x38] sm:$0xff] }
  0x13   : > { %v200_v8 = vmul.f32 %v363_v0, %v176_v7  ;;  %v180_v9 = vld [vmem:[%s424_s21 + $0x28] sm:$0xff]  ;;  %v203_v16 = vmul.f32 %v363_v0, %v179_v10  ;;  %v181_v18 = vld [vmem:[%s424_s21 + $0x30] sm:$0xff]  ;;  %v206_v21 = vmul.f32 %v363_v0, %v182_v17  ;;  %v183_v24 = vld [vmem:[%s424_s21 + $0x40] sm:$0xff] }
  0x14   : > { %v222_v11 = vsel %vm215_vm0, %v201_v4, 0.0  ;;  %v216_v12 = vsel %vm215_vm0, %v199_v5, 0.0  ;;  %v225_v13 = vsel %vm215_vm0, %v202_v6, 0.0  ;;  %v204_v15 = vmul.f32 %v363_v0, %v180_v9  ;;  %v184_v23 = vld [vmem:[%s424_s21 + $0x48] sm:$0xff]  ;;  %v186_v29 = vld [vmem:[%s424_s21 + $0x58] sm:$0xff]  ;;  %v185_v30 = vld [vmem:[%s424_s21 + $0x50] sm:$0xff] }
  0x15   : > { %223 = vadd.xlane.f32.xlu1 %v222_v11  ;;  %217 = vadd.xlane.f32.xlu0 %v216_v12  ;;  %v219_v14 = vsel %vm215_vm0, %v200_v8, 0.0  ;;  %v228_v20 = vsel %vm215_vm0, %v203_v16, 0.0  ;;  %v205_v22 = vmul.f32 %v363_v0, %v181_v18  ;;  %v237_v25 = vsel %vm215_vm0, %v206_v21, 0.0  ;;  %v188_v35 = vld [vmem:[%s424_s21 + $0x68] sm:$0xff]  ;;  %v187_v36 = vld [vmem:[%s424_s21 + $0x60] sm:$0xff]  ;;  %v190_v41 = vld [vmem:[%s424_s21 + $0x78] sm:$0xff] }
  0x16   : > { %v231_v19 = vsel %vm215_vm0, %v204_v15, 0.0  ;;  %v208_v27 = vmul.f32 %v363_v0, %v184_v23  ;;  %v207_v28 = vmul.f32 %v363_v0, %v183_v24  ;;  %v210_v33 = vmul.f32 %v363_v0, %v186_v29  ;;  %v189_v42 = vld [vmem:[%s424_s21 + $0x70] sm:$0xff] }
  0x17   : > { %v234_v26 = vsel %vm215_vm0, %v205_v22, 0.0  ;;  %v209_v34 = vmul.f32 %v363_v0, %v185_v30  ;;  %v212_v39 = vmul.f32 %v363_v0, %v188_v35  ;;  %v211_v40 = vmul.f32 %v363_v0, %v187_v36 }
  0x18   : > { %v243_v31 = vsel %vm215_vm0, %v208_v27, 0.0  ;;  %v240_v32 = vsel %vm215_vm0, %v207_v28, 0.0  ;;  %v249_v37 = vsel %vm215_vm0, %v210_v33, 0.0  ;;  %v214_v45 = vmul.f32 %v363_v0, %v190_v41 }
  0x19   : > { %226 = vadd.xlane.f32.xlu1 %v225_v13  ;;  %220 = vadd.xlane.f32.xlu0 %v219_v14  ;;  %v246_v38 = vsel %vm215_vm0, %v209_v34, 0.0  ;;  %v255_v43 = vsel %vm215_vm0, %v212_v39, 0.0  ;;  %v252_v44 = vsel %vm215_vm0, %v211_v40, 0.0  ;;  %v213_v46 = vmul.f32 %v363_v0, %v189_v42 }
  0x1a   : > { %v261_v47 = vsel %vm215_vm0, %v214_v45, 0.0 }
  0x1b   : > { %v258_v48 = vsel %vm215_vm0, %v213_v46, 0.0 }
  0x1d   : > { %232 = vadd.xlane.f32.xlu1 %v231_v19  ;;  %229 = vadd.xlane.f32.xlu0 %v228_v20 }
  0x21   : > { %238 = vadd.xlane.f32.xlu1 %v237_v25  ;;  %235 = vadd.xlane.f32.xlu0 %v234_v26 }
  0x25   : > { %244 = vadd.xlane.f32.xlu1 %v243_v31  ;;  %241 = vadd.xlane.f32.xlu0 %v240_v32 }
  0x29   : > { %250 = vadd.xlane.f32.xlu1 %v249_v37  ;;  %247 = vadd.xlane.f32.xlu0 %v246_v38 }
  0x2d   : > { %256 = vadd.xlane.f32.xlu1 %v255_v43  ;;  %253 = vadd.xlane.f32.xlu0 %v252_v44 }
  0x31   : > { %262 = vadd.xlane.f32.xlu1 %v261_v47  ;;  %259 = vadd.xlane.f32.xlu0 %v258_v48 }
  0xa2   : > { %v224_v50 = vpop.xlane.xlu1 %223  ;;  %v218_v51 = vpop.xlane.xlu0 %217 }
  0xa3   : > { %v267_v52 = vadd.f32 %v264_v49, %v224_v50  ;;  %v265_v53 = vadd.f32 %v264_v49, %v218_v51 }
  0xa5   : > { %284 = vst.msk [vmem:[%s463_s25 + $0x10] sm:$0xff] %vm281_vm1, %v267_v52  ;;  %282 = vst.msk [vmem:[%s463_s25] sm:$0xff] %vm281_vm1, %v265_v53 }
  0xa6   : > { %v227_v54 = vpop.xlane.xlu1 %226  ;;  %v221_v55 = vpop.xlane.xlu0 %220 }
  0xa7   : > { %v268_v56 = vadd.f32 %v264_v49, %v227_v54  ;;  %v266_v57 = vadd.f32 %v264_v49, %v221_v55 }
  0xa9   : > { %285 = vst.msk [vmem:[%s463_s25 + $0x18] sm:$0xff] %vm281_vm1, %v268_v56  ;;  %283 = vst.msk [vmem:[%s463_s25 + $0x8] sm:$0xff] %vm281_vm1, %v266_v57 }
  0xaa   : > { %v233_v58 = vpop.xlane.xlu1 %232  ;;  %v230_v59 = vpop.xlane.xlu0 %229 }
  0xab   : > { %v270_v60 = vadd.f32 %v264_v49, %v233_v58  ;;  %v269_v61 = vadd.f32 %v264_v49, %v230_v59 }
  0xad   : > { %287 = vst.msk [vmem:[%s463_s25 + $0x28] sm:$0xff] %vm281_vm1, %v270_v60  ;;  %286 = vst.msk [vmem:[%s463_s25 + $0x20] sm:$0xff] %vm281_vm1, %v269_v61 }
  0xae   : > { %v239_v62 = vpop.xlane.xlu1 %238  ;;  %v236_v63 = vpop.xlane.xlu0 %235 }
  0xaf   : > { %v272_v0 = vadd.f32 %v264_v49, %v239_v62  ;;  %v271_v1 = vadd.f32 %v264_v49, %v236_v63 }
  0xb1   : > { %289 = vst.msk [vmem:[%s463_s25 + $0x38] sm:$0xff] %vm281_vm1, %v272_v0  ;;  %288 = vst.msk [vmem:[%s463_s25 + $0x30] sm:$0xff] %vm281_vm1, %v271_v1 }
  0xb2   : > { %v245_v2 = vpop.xlane.xlu1 %244  ;;  %v242_v3 = vpop.xlane.xlu0 %241 }
  0xb3   : > { %v274_v4 = vadd.f32 %v264_v49, %v245_v2  ;;  %v273_v5 = vadd.f32 %v264_v49, %v242_v3 }
  0xb5   : > { %291 = vst.msk [vmem:[%s463_s25 + $0x48] sm:$0xff] %vm281_vm1, %v274_v4  ;;  %290 = vst.msk [vmem:[%s463_s25 + $0x40] sm:$0xff] %vm281_vm1, %v273_v5 }
  0xb6   : > { %v251_v6 = vpop.xlane.xlu1 %250  ;;  %v248_v7 = vpop.xlane.xlu0 %247 }
  0xb7   : > { %v276_v8 = vadd.f32 %v264_v49, %v251_v6  ;;  %v275_v9 = vadd.f32 %v264_v49, %v248_v7 }
  0xb9   : > { %293 = vst.msk [vmem:[%s463_s25 + $0x58] sm:$0xff] %vm281_vm1, %v276_v8  ;;  %292 = vst.msk [vmem:[%s463_s25 + $0x50] sm:$0xff] %vm281_vm1, %v275_v9 }
  0xba   : > { %v257_v10 = vpop.xlane.xlu1 %256  ;;  %v254_v11 = vpop.xlane.xlu0 %253 }
  0xbb   : > { %v278_v12 = vadd.f32 %v264_v49, %v257_v10  ;;  %v277_v13 = vadd.f32 %v264_v49, %v254_v11 }
  0xbd   : > { %295 = vst.msk [vmem:[%s463_s25 + $0x68] sm:$0xff] %vm281_vm1, %v278_v12  ;;  %294 = vst.msk [vmem:[%s463_s25 + $0x60] sm:$0xff] %vm281_vm1, %v277_v13 }
  0xbe   : > { %v263_v14 = vpop.xlane.xlu1 %262  ;;  %v260_v15 = vpop.xlane.xlu0 %259 }
  0xbf   : > { %v280_v16 = vadd.f32 %v264_v49, %v263_v14  ;;  %v279_v17 = vadd.f32 %v264_v49, %v260_v15 }
  0xc1   : > { %297 = vst.msk [vmem:[%s463_s25 + $0x78] sm:$0xff] %vm281_vm1, %v280_v16  ;;  %296 = vst.msk [vmem:[%s463_s25 + $0x70] sm:$0xff] %vm281_vm1, %v279_v17 }
  0xc2 PF: > { %s14_s14 = sadd.s32 1, %s380_s14  }
  0xc3   : > { %p11_p4 = scmp.ge.s32.totalorder %s14_s14, 5  }
  0xc5   :  { %13 = sbr.rel (!%p11_p4) target bundleno = 2 (0x2), region = 62 }

</bundles_post_ra>
